<compile_context>
chip_gen: v7x
topology: tpu7x:2x2x1
jax: 0.10.0
libtpu: 0.0.40
codegen_flags: <defaults>
</compile_context>

<pallas_src>
import jax
import jax.numpy as jnp
from jax.experimental import pallas as pl
from jax.experimental.pallas import tpu as pltpu

# ----------------------- small, deterministic configuration -----------------
CATEGORIES = ["person", "car", "dog", "cat"]
NUM_CLASSES = len(CATEGORIES)            # len(self._categories)
B = 2                                    # images
IMG_C, IMG_H, IMG_W = 3, 32, 32
ROIS_PER_IMG = 8
N_ROI = B * ROIS_PER_IMG
C = 32                                   # stand-in for 256 FPN / mask-head chans
P_BOX = 4                                # stand-in for 7x7 box RoIAlign
P_MASK = 8                               # stand-in for 14x14 mask RoIAlign
BOX_IN = C * P_BOX * P_BOX               # flattened box-head input (≈ 12544)
REPR = 64                                # stand-in for representation_size 1024
REPR_PAD = 128                           # lane-dense padded hidden width
DIM_RED = C                              # MaskRCNNPredictor dim_reduced (≈ 256)
BOX_OUT = NUM_CLASSES + 4 * NUM_CLASSES  # fused cls + bbox output width (20)
BOX_OUT_PAD = 128                        # padded to one lane width -> unmasked stores
MASK_HID = 4 * DIM_RED                   # fused 4-quadrant deconv width (128 = 1 lane)
MASK_OUT = 4 * NUM_CLASSES               # per-quadrant class logits (16)
MASK_OUT_PAD = 128                       # padded to one lane width -> unmasked stores
MASK_ROW_TILE = 512                      # >=512-row tiles reach ~85% HBM roofline


# ----------------------------- Pallas kernels --------------------------------
def _box_branch_kernel(x_ref, w6_ref, b6_ref, w7_ref, b7_ref,
                       wcb_ref, bcb_ref, out_ref):
    """TwoMLPHead + fused FastRCNNPredictor (all widths lane-dense, 128).

    x: [N, BOX_IN] -> out: [N, BOX_OUT_PAD]  (cols 0:K = cls, K:5K = bbox, rest 0)
    """
    h = jnp.dot(x_ref[...], w6_ref[...], preferred_element_type=jnp.float32) + b6_ref[...]
    h = jnp.maximum(h, 0.0)
    h = jnp.dot(h, w7_ref[...], preferred_element_type=jnp.float32) + b7_ref[...]
    h = jnp.maximum(h, 0.0)
    out_ref[...] = (jnp.dot(h, wcb_ref[...], preferred_element_type=jnp.float32)
                    + bcb_ref[...])


def _mask_predictor_kernel(x_ref, wt_ref, bt_ref, w1_ref, b1_ref, out_ref):
    """MaskRCNNPredictor for one row-tile of flattened ROI positions.

    x_ref : (TILE, C)               pooled mask features, rows = (roi, h, w)
    wt_ref: (C, 4*DIM_RED)          4 deconv quadrants concatenated (lane-dense)
    w1_ref: (4*DIM_RED, 128)        block-diag 1x1 conv, zero-padded to a lane
    out_ref: (TILE, 128)            cols 0:16 = (quadrant q = 2*di+dj, class k)
    """
    h = jnp.dot(x_ref[...], wt_ref[...], preferred_element_type=jnp.float32) + bt_ref[...]
    h = jnp.maximum(h, 0.0)                        # ReLU after conv5_mask
    out_ref[...] = (jnp.dot(h, w1_ref[...], preferred_element_type=jnp.float32)
                    + b1_ref[...])


# ----------------------------- wrappers --------------------------------------
def box_branch(box_feats, p):
    n = box_feats.shape[0]
    # Toy-size single ungridded call; see real-scale TODO for the (ROI, K) grid.
    out = pl.pallas_call(
        _box_branch_kernel,
        out_shape=jax.ShapeDtypeStruct((n, BOX_OUT_PAD), jnp.float32),
    )(box_feats, p["w6_pad"], p["b6_pad"], p["w7_pad"], p["b7_pad"],
      p["wcb_pad"], p["bcb_pad"])
    # Slice in the same order used at concat time: [cls | bbox | zero-pad].
    cls_logits = out[:, :NUM_CLASSES]
    bbox_deltas = out[:, NUM_CLASSES:BOX_OUT]
    return cls_logits, bbox_deltas


def mask_predictor(mask_feats, p):
    n, H, W, Cc = mask_feats.shape
    K = NUM_CLASSES
    rows = n * H * W
    # Layout done once in the wrapper (no in-kernel reshape): rows = (roi, h, w).
    # TODO(synk): x_flat's 32-wide lane axis wastes 3/4 of each vreg at toy size;
    # accepted because the real-scale C=256 feature width makes it moot.
    x_flat = mask_feats.reshape(rows, Cc)
    row_tile = MASK_ROW_TILE if rows % MASK_ROW_TILE == 0 else rows
    quad = pl.pallas_call(
        _mask_predictor_kernel,
        out_shape=jax.ShapeDtypeStruct((rows, MASK_OUT_PAD), jnp.float32),
        grid_spec=pltpu.PrefetchScalarGridSpec(
            num_scalar_prefetch=0,
            grid=(rows // row_tile,),
            in_specs=[
                pl.BlockSpec((row_tile, Cc), lambda i: (i, 0)),
                pl.BlockSpec((Cc, MASK_HID), lambda i: (0, 0)),
                pl.BlockSpec((1, MASK_HID), lambda i: (0, 0)),
                pl.BlockSpec((MASK_HID, MASK_OUT_PAD), lambda i: (0, 0)),
                pl.BlockSpec((1, MASK_OUT_PAD), lambda i: (0, 0)),
            ],
            out_specs=pl.BlockSpec((row_tile, MASK_OUT_PAD), lambda i: (i, 0)),
        ),
        compiler_params=pltpu.CompilerParams(
            dimension_semantics=("parallel",)),      # shards rows across v7x's 2 TCs
    )(x_flat, p["wt_cat"], p["bt_cat"], p["w1_bd_pad"], p["b1_cat_pad"])
    # Drop the zero lane-padding BEFORE the quadrant interleave.
    quad = quad[:, :MASK_OUT]
    # Layout plumbing (plain JAX, once): interleave the 4 stride-2 quadrants.
    # quad[(n*H + i)*W + j, (2*di+dj)*K + k] -> out[n, 2*i+di, 2*j+dj, k]
    out = quad.reshape(n, H, W, 2, 2, K)
    out = jnp.transpose(out, (0, 1, 3, 2, 4, 5)).reshape(n, 2 * H, 2 * W, K)
    return jnp.transpose(out, (0, 3, 1, 2))           # NCHW, like PyTorch


def _placeholder_roi_features(images_nchw):
    # TODO(synk): the real pipeline is ResNet50-FPN backbone -> RPN proposals ->
    # RoIAlign; here we synthesize deterministic pooled ROI features directly
    # from the input images so the Pallas head kernels have a live input path.
    imgs = jnp.mean(images_nchw, axis=1)                     # (B, H, W)

    def pool(x, psize):
        b, h, w = x.shape
        return x.reshape(b, psize, h // psize, psize, w // psize).mean(axis=(2, 4))

    roi_scale = 1.0 + 0.1 * jnp.arange(ROIS_PER_IMG, dtype=jnp.float32)
    ch_scale = 1.0 + 0.01 * jnp.arange(C, dtype=jnp.float32)

    def make(pooled):                                        # (B, p, p) -> (N, p, p, C)
        f = (pooled[:, None, :, :, None]
             * roi_scale[None, :, None, None, None]
             * ch_scale[None, None, None, None, :])
        bb, rr, pp, _, cc = f.shape
        return f.reshape(bb * rr, pp, pp, cc)

    box_feats = make(pool(imgs, P_BOX)).reshape(N_ROI, BOX_IN)
    mask_feats = make(pool(imgs, P_MASK))                    # (N, P_MASK, P_MASK, C)
    return box_feats.astype(jnp.float32), mask_feats.astype(jnp.float32)


def maskrcnn_forward(images_nchw, params):
    box_feats, mask_feats = _placeholder_roi_features(images_nchw)
    cls_logits, bbox_deltas = box_branch(box_feats, params)
    mask_logits = mask_predictor(mask_feats, params)
    # TODO(synk): detection postprocessing (softmax scores, box decode, NMS,
    # per-class mask selection / paste-in-image) omitted -- data-dependent
    # control flow outside the kernel hot path.
    return cls_logits, bbox_deltas, mask_logits


# ----------------------------- parameters ------------------------------------
def init_params(key):
    ks = jax.random.split(key, 12)
    s = 0.05
    p = {}
    # TwoMLPHead (reference, unpadded)
    p["w6"] = s * jax.random.normal(ks[0], (BOX_IN, REPR), jnp.float32)
    p["b6"] = s * jax.random.normal(ks[1], (1, REPR), jnp.float32)
    p["w7"] = s * jax.random.normal(ks[2], (REPR, REPR), jnp.float32)
    p["b7"] = s * jax.random.normal(ks[3], (1, REPR), jnp.float32)
    # Lane-dense padded variants for the kernel (padded cols/rows are zero, so
    # the extra hidden units stay exactly 0 through bias-add and ReLU).
    pad = REPR_PAD - REPR
    p["w6_pad"] = jnp.pad(p["w6"], ((0, 0), (0, pad)))                     # (BOX_IN, 128)
    p["b6_pad"] = jnp.pad(p["b6"], ((0, 0), (0, pad)))                     # (1, 128)
    p["w7_pad"] = jnp.pad(p["w7"], ((0, pad), (0, pad)))                   # (128, 128)
    p["b7_pad"] = jnp.pad(p["b7"], ((0, 0), (0, pad)))                     # (1, 128)
    # FastRCNNPredictor(in_features, num_classes)
    p["wc"] = s * jax.random.normal(ks[4], (REPR, NUM_CLASSES), jnp.float32)
    p["bc"] = s * jax.random.normal(ks[5], (1, NUM_CLASSES), jnp.float32)
    p["wb"] = s * jax.random.normal(ks[6], (REPR, 4 * NUM_CLASSES), jnp.float32)
    p["bb"] = s * jax.random.normal(ks[7], (1, 4 * NUM_CLASSES), jnp.float32)
    # Fused cls+bbox weight, zero-padded on both axes (rows to REPR_PAD, cols to
    # one full lane width) -> unmasked stores.
    wcb = jnp.concatenate([p["wc"], p["wb"]], axis=1)                      # (REPR, 20)
    bcb = jnp.concatenate([p["bc"], p["bb"]], axis=1)                      # (1, 20)
    p["wcb_pad"] = jnp.pad(wcb, ((0, pad), (0, BOX_OUT_PAD - BOX_OUT)))    # (128, 128)
    p["bcb_pad"] = jnp.pad(bcb, ((0, 0), (0, BOX_OUT_PAD - BOX_OUT)))      # (1, 128)
    # MaskRCNNPredictor(in_channels=C, dim_reduced=DIM_RED, num_classes)
    wt = s * jax.random.normal(ks[8], (C, DIM_RED, 2, 2), jnp.float32)     # torch layout
    p["wt_torch"] = wt
    # Quadrant q = 2*di+dj, concatenated along the output axis -> (C, 4*DIM_RED)=(32,128)
    wt_q = jnp.transpose(wt, (2, 3, 0, 1)).reshape(4, C, DIM_RED)
    p["wt_cat"] = jnp.transpose(wt_q, (1, 0, 2)).reshape(C, MASK_HID)
    p["bt"] = s * jax.random.normal(ks[9], (1, DIM_RED), jnp.float32)
    p["bt_cat"] = jnp.tile(p["bt"], (1, 4))                                # (1, 128)
    w1 = s * jax.random.normal(ks[10], (NUM_CLASSES, DIM_RED, 1, 1), jnp.float32)
    p["w1_torch"] = w1
    w1m = jnp.transpose(w1.reshape(NUM_CLASSES, DIM_RED), (1, 0))          # (DIM_RED, K)
    p["w1"] = w1m
    # Block-diagonal 1x1 conv: quadrant q rows map only to quadrant q class cols.
    # TODO(synk): at real scale the block-diagonal weight (75% zeros) should be
    # replaced by a per-quadrant contraction; harmless at toy sizes.
    w1_bd = jnp.einsum("qr,ok->qork", jnp.eye(4, dtype=jnp.float32),
                       w1m).reshape(MASK_HID, MASK_OUT)                    # (128, 16)
    p["b1"] = s * jax.random.normal(ks[11], (1, NUM_CLASSES), jnp.float32)
    b1_cat = jnp.tile(p["b1"], (1, 4))                                     # (1, 16)
    # Zero-pad the 16 real output columns to one full lane width (128) so the
    # mask kernel's stores are unmasked `vst` (wrapper slices [:, :MASK_OUT]).
    p["w1_bd_pad"] = jnp.pad(w1_bd, ((0, 0), (0, MASK_OUT_PAD - MASK_OUT)))  # (128, 128)
    p["b1_cat_pad"] = jnp.pad(b1_cat, ((0, 0), (0, MASK_OUT_PAD - MASK_OUT)))  # (1, 128)
    return p


# ------------------------- pure-JAX references --------------------------------
def _ref_box(x, p):
    h = jnp.maximum(x @ p["w6"] + p["b6"], 0.0)
    h = jnp.maximum(h @ p["w7"] + p["b7"], 0.0)
    return h @ p["wc"] + p["bc"], h @ p["wb"] + p["bb"]


def _ref_mask(x_nhwc, p):
    n, H, W, _ = x_nhwc.shape
    wt = p["wt_torch"]                                         # (C, O, 2, 2)
    # PyTorch ConvTranspose2d(kernel=2, stride=2, pad=0):
    t = jnp.einsum("nhwc,coij->nhiwjo", x_nhwc, wt)
    y = t.reshape(n, 2 * H, 2 * W, DIM_RED) + p["bt"]
    y = jnp.maximum(y, 0.0)
    logits = jnp.einsum("nhwo,ok->nhwk", y, p["w1"]) + p["b1"]
    return jnp.transpose(logits, (0, 3, 1, 2))                 # NCHW


# --------------------------------- main ---------------------------------------
if __name__ == "__main__":
    key = jax.random.PRNGKey(0)
    k_img, k_par = jax.random.split(key)
    images = jax.random.normal(k_img, (B, IMG_C, IMG_H, IMG_W), jnp.float32)
    params = init_params(k_par)

    cls_logits, bbox_deltas, mask_logits = maskrcnn_forward(images, params)
    jax.block_until_ready((cls_logits, bbox_deltas, mask_logits))

    # sanity check against pure-JAX references
    box_feats, mask_feats = _placeholder_roi_features(images)
    cls_ref, bbox_ref = _ref_box(box_feats, params)
    mask_ref = _ref_mask(mask_feats, params)
    assert cls_logits.shape == (N_ROI, NUM_CLASSES)
    assert bbox_deltas.shape == (N_ROI, 4 * NUM_CLASSES)
    assert mask_logits.shape == (N_ROI, NUM_CLASSES, 2 * P_MASK, 2 * P_MASK)
    assert jnp.allclose(cls_logits, cls_ref, atol=1e-4, rtol=1e-4)
    assert jnp.allclose(bbox_deltas, bbox_ref, atol=1e-4, rtol=1e-4)
    assert jnp.allclose(mask_logits, mask_ref, atol=1e-4, rtol=1e-4)

    print("KERNEL_OK")
</pallas_src>

<mosaic_0001>
module attributes {stable_mosaic.version = 11 : i64} {
  func.func @_box_branch_kernel(%arg0: memref<16x512xf32, #tpu.memory_space<vmem>>, %arg1: memref<512x128xf32, #tpu.memory_space<vmem>>, %arg2: memref<1x128xf32, #tpu.memory_space<vmem>>, %arg3: memref<128x128xf32, #tpu.memory_space<vmem>>, %arg4: memref<1x128xf32, #tpu.memory_space<vmem>>, %arg5: memref<128x128xf32, #tpu.memory_space<vmem>>, %arg6: memref<1x128xf32, #tpu.memory_space<vmem>>, %arg7: memref<16x128xf32, #tpu.memory_space<vmem>>) attributes {dimension_semantics = [], scalar_prefetch = 0 : i64, scratch_operands = 0 : i64, tpu.core_type = #tpu.core_type<tc>} {
    %c0 = arith.constant 0 : index
    %c0_0 = arith.constant 0 : index
    %0 = vector.load %arg0[%c0, %c0_0] : memref<16x512xf32, #tpu.memory_space<vmem>>, vector<16x512xf32>
    %c0_1 = arith.constant 0 : index
    %c0_2 = arith.constant 0 : index
    %1 = vector.load %arg1[%c0_1, %c0_2] : memref<512x128xf32, #tpu.memory_space<vmem>>, vector<512x128xf32>
    %cst = arith.constant dense<0.000000e+00> : vector<16x128xf32>
    %2 = tpu.matmul %0, %1, %cst {dimension_numbers = #tpu.dot_dimension_numbers<[1], [0], [0], [1], [0, 0, 1, 1], [], []>} : vector<16x512xf32>, vector<512x128xf32>, vector<16x128xf32> -> vector<16x128xf32>
    %c0_3 = arith.constant 0 : index
    %c0_4 = arith.constant 0 : index
    %3 = vector.load %arg2[%c0_3, %c0_4] : memref<1x128xf32, #tpu.memory_space<vmem>>, vector<1x128xf32>
    %4 = vector.broadcast %3 : vector<1x128xf32> to vector<16x128xf32>
    %5 = arith.addf %2, %4 : vector<16x128xf32>
    %cst_5 = arith.constant 0.000000e+00 : f32
    %6 = vector.broadcast %cst_5 : f32 to vector<16x128xf32>
    %7 = arith.maximumf %5, %6 : vector<16x128xf32>
    %c0_6 = arith.constant 0 : index
    %c0_7 = arith.constant 0 : index
    %8 = vector.load %arg3[%c0_6, %c0_7] : memref<128x128xf32, #tpu.memory_space<vmem>>, vector<128x128xf32>
    %cst_8 = arith.constant dense<0.000000e+00> : vector<16x128xf32>
    %9 = tpu.matmul %7, %8, %cst_8 {dimension_numbers = #tpu.dot_dimension_numbers<[1], [0], [0], [1], [0, 0, 1, 1], [], []>} : vector<16x128xf32>, vector<128x128xf32>, vector<16x128xf32> -> vector<16x128xf32>
    %c0_9 = arith.constant 0 : index
    %c0_10 = arith.constant 0 : index
    %10 = vector.load %arg4[%c0_9, %c0_10] : memref<1x128xf32, #tpu.memory_space<vmem>>, vector<1x128xf32>
    %11 = vector.broadcast %10 : vector<1x128xf32> to vector<16x128xf32>
    %12 = arith.addf %9, %11 : vector<16x128xf32>
    %cst_11 = arith.constant 0.000000e+00 : f32
    %13 = vector.broadcast %cst_11 : f32 to vector<16x128xf32>
    %14 = arith.maximumf %12, %13 : vector<16x128xf32>
    %c0_12 = arith.constant 0 : index
    %c0_13 = arith.constant 0 : index
    %15 = vector.load %arg5[%c0_12, %c0_13] : memref<128x128xf32, #tpu.memory_space<vmem>>, vector<128x128xf32>
    %cst_14 = arith.constant dense<0.000000e+00> : vector<16x128xf32>
    %16 = tpu.matmul %14, %15, %cst_14 {dimension_numbers = #tpu.dot_dimension_numbers<[1], [0], [0], [1], [0, 0, 1, 1], [], []>} : vector<16x128xf32>, vector<128x128xf32>, vector<16x128xf32> -> vector<16x128xf32>
    %c0_15 = arith.constant 0 : index
    %c0_16 = arith.constant 0 : index
    %17 = vector.load %arg6[%c0_15, %c0_16] : memref<1x128xf32, #tpu.memory_space<vmem>>, vector<1x128xf32>
    %18 = vector.broadcast %17 : vector<1x128xf32> to vector<16x128xf32>
    %19 = arith.addf %16, %18 : vector<16x128xf32>
    %c0_17 = arith.constant 0 : index
    %c0_18 = arith.constant 0 : index
    %20 = vector.load %arg7[%c0_17, %c0_18] : memref<16x128xf32, #tpu.memory_space<vmem>>, vector<16x128xf32>
    tpu.vector_store %arg7[%c0_17, %c0_18], %19 {strides = array<i32>} : memref<16x128xf32, #tpu.memory_space<vmem>>, vector<16x128xf32>,
    return
  }
}

</mosaic_0001>

<bundles_post_ra>
// kernel: tpu_custom_call.1
= control target key start
LH: loop header
LB: loop body
LE: loop exit
PB: predicated region body
PF: predicated region fallthrough
CT: control target
= control target key end

     0   :  { %12 = vsyncpa [#allocation3], 0  ;;  %s1109_s0 = inlined_call_operand.hbm [shape: f32[16,512], index: 0, kind: input, shape index: {}]   ;;  %s1110_s1 = inlined_call_operand.hbm [shape: f32[512,128], index: 1, kind: input, shape index: {}]   ;;  %s1111_s2 = inlined_call_operand.vmem [shape: f32[1,128], index: 2, kind: input, shape index: {}]   ;;  %s1112_s3 = inlined_call_operand.hbm [shape: f32[128,128], index: 3, kind: input, shape index: {}]   ;;  %s1113_s4 = inlined_call_operand.vmem [shape: f32[1,128], index: 4, kind: input, shape index: {}]   ;;  %s1114_s5 = inlined_call_operand.hbm [shape: f32[128,128], index: 5, kind: input, shape index: {}]   ;;  %s1115_s6 = inlined_call_operand.vmem [shape: f32[1,128], index: 6, kind: input, shape index: {}]   ;;  %s1116_s7 = inlined_call_operand.hbm [shape: f32[16,128], index: 7, kind: output, shape index: {}]  }
   0x1   :  { %13 = vsyncpa [#allocation6], 0 }
   0x2   :  { %14 = vsyncpa [#allocation9], 0 }
   0x3   :  { %15 = vsyncpa [#allocation4], 0  ;;  %s972_s24 = smov [#allocation5]   ;;  %s854_s28 = scalar_lea.hbm %s1110_s1, 8192 }
   0x4   :  { %s33_s25 = sshll.u32 %s972_s24, 4  ;;  %p855_p0 = scmp.ne.s32.totalorder %s1110_s1, %s854_s28  ;;  %s34_s25 = int_to_ptr.vmem [resolvable:$true] %s33_s25 }
   0x5   :  { %p858_p1 = scmp.lt.u32.totalorder %s854_s28, %s1110_s1 }
   0x7   :  { %p860_p2 = pnand %p858_p1, %p855_p0 }
   0x9   :  { %863 = shalt.err (!%p860_p2)
}
   0xa   :  { %s864_s10 = scalar_lea.vmem %s34_s25, 8192  ;;  %p869_p4 = scmp.lt.s32.totalorder %s34_s25, %s34_s25 }
   0xb   :  { %p865_p3 = scmp.ne.s32.totalorder %s34_s25, %s864_s10  ;;  %p870_p5 = scmp.lt.s32.totalorder %s864_s10, %s864_s10 }
   0xd   :  { %p871_p6 = por %p870_p5, %p869_p4 }
   0xf   :  { %p872_p7 = pnand %p871_p6, %p865_p3 }
  0x11   :  { %875 = shalt.err (!%p872_p7)
}
  0x12   :  { %s973_s11 = smov 128   ;;  %s974_s12 = smov 8  }
  0x13   :  { %39 = dma.hbm_to_vmem [thread:$0]  %s1110_s1, 8192, %s34_s25, [#allocation6], %s973_s11, %s973_s11, %s974_s12  }
  0x14   :  { %s975_s15 = smov [#allocation2]   ;;  %s876_s19 = scalar_lea.hbm %s1109_s0, 1024 }
  0x15   :  { %s21_s16 = sshll.u32 %s975_s15, 4  ;;  %p877_p8 = scmp.ne.s32.totalorder %s1109_s0, %s876_s19  ;;  %s22_s16 = int_to_ptr.vmem [resolvable:$true] %s21_s16 }
  0x16   :  { %p880_p9 = scmp.lt.u32.totalorder %s876_s19, %s1109_s0 }
  0x18   :  { %p882_p10 = pnand %p880_p9, %p877_p8 }
  0x1a   :  { %885 = shalt.err (!%p882_p10)
}
  0x1b   :  { %s886_s24 = scalar_lea.vmem %s22_s16, 1024  ;;  %p891_p12 = scmp.lt.s32.totalorder %s22_s16, %s22_s16 }
  0x1c   :  { %p887_p11 = scmp.ne.s32.totalorder %s22_s16, %s886_s24  ;;  %p892_p13 = scmp.lt.s32.totalorder %s886_s24, %s886_s24 }
  0x1e   :  { %p893_p0 = por %p892_p13, %p891_p12 }
  0x20   :  { %p894_p1 = pnand %p893_p0, %p887_p11 }
  0x22   :  { %897 = shalt.err (!%p894_p1)
}
  0x23   :  { %s976_s1 = smov 512   ;;  %s977_s25 = smov 32  }
  0x24   :  { %27 = dma.hbm_to_vmem [thread:$0]  %s1109_s0, 1024, %s22_s16, [#allocation3], %s976_s1, %s976_s1, %s977_s25  }
  0x25   :  { %s978_s28 = smov [#allocation7]   ;;  %s979_s30 = smov [#allocation8]  }
  0x26   :  { %s47_s29 = sshll.u32 %s978_s28, 4  ;;  %s61_s8 = sshll.u32 %s979_s30, 4  ;;  %s48_s29 = int_to_ptr.vmem [resolvable:$true] %s47_s29  ;;  %s1048_s8 = int_to_ptr.vmem [resolvable:$true] %s61_s8 }
  0x27   :  { %s898_s13 = scalar_lea.hbm %s1112_s3, 2048 }
  0x28   :  { %p899_p2 = scmp.ne.s32.totalorder %s1112_s3, %s898_s13  ;;  %p902_p3 = scmp.lt.u32.totalorder %s898_s13, %s1112_s3 }
  0x2a   :  { %p904_p4 = pnand %p902_p3, %p899_p2 }
  0x2c   :  { %907 = shalt.err (!%p904_p4)
}
  0x2d   :  { %s908_s0 = scalar_lea.vmem %s48_s29, 2048  ;;  %p913_p6 = scmp.lt.s32.totalorder %s48_s29, %s48_s29 }
  0x2e   :  { %p909_p5 = scmp.ne.s32.totalorder %s48_s29, %s908_s0  ;;  %p914_p7 = scmp.lt.s32.totalorder %s908_s0, %s908_s0 }
  0x30   :  { %p915_p8 = por %p914_p7, %p913_p6 }
  0x32   :  { %p916_p9 = pnand %p915_p8, %p909_p5 }
  0x34   :  { %919 = shalt.err (!%p916_p9)
}
  0x35   :  { %53 = dma.hbm_to_vmem [thread:$0]  %s1112_s3, 2048, %s48_s29, [#allocation6], %s973_s11, %s973_s11, %s974_s12  }
  0x36   :  { %s920_s22 = scalar_lea.hbm %s1114_s5, 2048 }
  0x37   :  { %p921_p10 = scmp.ne.s32.totalorder %s1114_s5, %s920_s22  ;;  %p924_p11 = scmp.lt.u32.totalorder %s920_s22, %s1114_s5 }
  0x39   :  { %p926_p12 = pnand %p924_p11, %p921_p10 }
  0x3b   :  { %929 = shalt.err (!%p926_p12)
}
  0x3c   :  { %s930_s26 = scalar_lea.vmem %s1048_s8, 2048  ;;  %p935_p0 = scmp.lt.s32.totalorder %s1048_s8, %s1048_s8 }
  0x3d   :  { %p931_p13 = scmp.ne.s32.totalorder %s1048_s8, %s930_s26  ;;  %p936_p1 = scmp.lt.s32.totalorder %s930_s26, %s930_s26 }
  0x3f   :  { %p937_p2 = por %p936_p1, %p935_p0 }
  0x41   :  { %p938_p3 = pnand %p937_p2, %p931_p13 }
  0x43   :  { %941 = shalt.err (!%p938_p3)
}
  0x44   :  { %67 = dma.hbm_to_vmem [thread:$0]  %s1114_s5, 2048, %s1048_s8, [#allocation9], %s973_s11, %s973_s11, %s974_s12  }
  0x45   :  { %964 = dma.done.wait [#allocation3], 1024  }
  0x46   :  { %965 = vsyncadd [#allocation3], 4294966272 }
  0x47   :  { %966 = dma.done.wait [#allocation6], 10240  }
  0x48   :  { %967 = vsyncadd [#allocation6], 4294957056 }
  0x49   :  { %968 = dma.done.wait [#allocation9], 2048  }
  0x4a   :  { %969 = vsyncadd [#allocation9], 4294965248  ;;  %v106_v0 = vld [vmem:[#allocation5 + $0x80] sm:$0xff]  ;;  %v107_v1 = vld [vmem:[#allocation5 + $0x88] sm:$0xff]  ;;  %s980_s9 = smov [#allocation10]  }
  0x4b   :  { %v90_v2 = vld [vmem:[#allocation5] sm:$0xff]  ;;  %v717_v3 = vpack.c.bf16 %v107_v1, %v106_v0  ;;  %v91_v4 = vld [vmem:[#allocation5 + $0x8] sm:$0xff]  ;;  %v108_v11 = vld [vmem:[#allocation5 + $0x90] sm:$0xff]  ;;  %s518_s10 = sshll.u32 %s980_s9, 4  ;;  %s519_s10 = int_to_ptr.vmem [resolvable:$true] %s518_s10 }
  0x4c   :  { %v138_v5 = vld [vmem:[#allocation5 + $0x180] sm:$0xff]  ;;  %v139_v6 = vld [vmem:[#allocation5 + $0x188] sm:$0xff]  ;;  %v719_v7 = vpack.c.bf16 %v91_v4, %v90_v2  ;;  %v109_v13 = vld [vmem:[#allocation5 + $0x98] sm:$0xff]  ;;  %p947_p5 = scmp.lt.s32.totalorder %s519_s10, %s519_s10 }
  0x4d   :  { %v749_v8 = vpack.c.bf16 %v139_v6, %v138_v5  ;;  %v122_v9 = vld [vmem:[#allocation5 + $0x100] sm:$0xff]  ;;  %v123_v10 = vld [vmem:[#allocation5 + $0x108] sm:$0xff]  ;;  %718 = vmatprep.subr.bf16.mxu0 %v717_v3  ;;  %v92_v14 = vld [vmem:[#allocation5 + $0x10] sm:$0xff]  ;;  %v721_v16 = vpack.c.bf16 %v109_v13, %v108_v11 }
  0x4e   :  { %v751_v12 = vpack.c.bf16 %v123_v10, %v122_v9  ;;  %v93_v15 = vld [vmem:[#allocation5 + $0x18] sm:$0xff]  ;;  %720 = vmatpush3.bf16.msra.mxu0 %v719_v7  ;;  %v140_v18 = vld [vmem:[#allocation5 + $0x190] sm:$0xff]  ;;  %v110_v23 = vld [vmem:[#allocation5 + $0xa0] sm:$0xff] }
  0x4f   :  { %750 = vmatprep.subr.bf16.mxu1 %v749_v8  ;;  %v723_v17 = vpack.c.bf16 %v93_v15, %v92_v14  ;;  %v141_v19 = vld [vmem:[#allocation5 + $0x198] sm:$0xff]  ;;  %v124_v20 = vld [vmem:[#allocation5 + $0x110] sm:$0xff]  ;;  %v111_v24 = vld [vmem:[#allocation5 + $0xa8] sm:$0xff]  ;;  %722 = vmatprep.subr.bf16.mxu0 %v721_v16 }
  0x50   :  { %752 = vmatpush3.bf16.msra.mxu1 %v751_v12  ;;  %v753_v21 = vpack.c.bf16 %v141_v19, %v140_v18  ;;  %v125_v22 = vld [vmem:[#allocation5 + $0x118] sm:$0xff]  ;;  %v725_v26 = vpack.c.bf16 %v111_v24, %v110_v23  ;;  %v94_v27 = vld [vmem:[#allocation5 + $0x20] sm:$0xff]  ;;  %v95_v28 = vld [vmem:[#allocation5 + $0x28] sm:$0xff] }
  0x51   :  { %v755_v25 = vpack.c.bf16 %v125_v22, %v124_v20  ;;  %v142_v29 = vld [vmem:[#allocation5 + $0x1a0] sm:$0xff]  ;;  %v143_v30 = vld [vmem:[#allocation5 + $0x1a8] sm:$0xff]  ;;  %v727_v33 = vpack.c.bf16 %v95_v28, %v94_v27  ;;  %v112_v35 = vld [vmem:[#allocation5 + $0xb0] sm:$0xff] }
  0x52   :  { %754 = vmatprep.subr.bf16.mxu1 %v753_v21  ;;  %v126_v31 = vld [vmem:[#allocation5 + $0x120] sm:$0xff]  ;;  %v127_v32 = vld [vmem:[#allocation5 + $0x128] sm:$0xff]  ;;  %724 = vmatpush3.bf16.msra.mxu0 %v723_v17  ;;  %v757_v34 = vpack.c.bf16 %v143_v30, %v142_v29  ;;  %v113_v36 = vld [vmem:[#allocation5 + $0xb8] sm:$0xff] }
  0x53   :  { %v96_v37 = vld [vmem:[#allocation5 + $0x30] sm:$0xff]  ;;  %726 = vmatprep.subr.bf16.mxu0 %v725_v26  ;;  %v759_v38 = vpack.c.bf16 %v127_v32, %v126_v31  ;;  %v729_v39 = vpack.c.bf16 %v113_v36, %v112_v35  ;;  %v97_v40 = vld [vmem:[#allocation5 + $0x38] sm:$0xff]  ;;  %v114_v46 = vld [vmem:[#allocation5 + $0xc0] sm:$0xff] }
  0x54   :  { %756 = vmatpush3.bf16.msra.mxu1 %v755_v25  ;;  %v144_v41 = vld [vmem:[#allocation5 + $0x1b0] sm:$0xff]  ;;  %v145_v42 = vld [vmem:[#allocation5 + $0x1b8] sm:$0xff]  ;;  %v115_v47 = vld [vmem:[#allocation5 + $0xc8] sm:$0xff]  ;;  %v731_v48 = vpack.c.bf16 %v97_v40, %v96_v37 }
  0x55   :  { %758 = vmatprep.subr.bf16.mxu1 %v757_v34  ;;  %v761_v43 = vpack.c.bf16 %v145_v42, %v144_v41  ;;  %v128_v44 = vld [vmem:[#allocation5 + $0x130] sm:$0xff]  ;;  %v129_v45 = vld [vmem:[#allocation5 + $0x138] sm:$0xff]  ;;  %v146_v49 = vld [vmem:[#allocation5 + $0x1c0] sm:$0xff]  ;;  %v733_v52 = vpack.c.bf16 %v115_v47, %v114_v46 }
  0x56   :  { %728 = vmatpush3.bf16.msra.mxu0 %v727_v33  ;;  %v147_v50 = vld [vmem:[#allocation5 + $0x1c8] sm:$0xff]  ;;  %v763_v51 = vpack.c.bf16 %v129_v45, %v128_v44  ;;  %v98_v53 = vld [vmem:[#allocation5 + $0x40] sm:$0xff]  ;;  %v116_v58 = vld [vmem:[#allocation5 + $0xd0] sm:$0xff] }
  0x57   :  { %730 = vmatprep.subr.bf16.mxu0 %v729_v39  ;;  %v99_v54 = vld [vmem:[#allocation5 + $0x48] sm:$0xff]  ;;  %v130_v55 = vld [vmem:[#allocation5 + $0x140] sm:$0xff]  ;;  %v765_v56 = vpack.c.bf16 %v147_v50, %v146_v49  ;;  %v117_v59 = vld [vmem:[#allocation5 + $0xd8] sm:$0xff] }
  0x58   :  { %760 = vmatpush3.bf16.msra.mxu1 %v759_v38  ;;  %v131_v57 = vld [vmem:[#allocation5 + $0x148] sm:$0xff]  ;;  %v148_v60 = vld [vmem:[#allocation5 + $0x1d0] sm:$0xff]  ;;  %v149_v61 = vld [vmem:[#allocation5 + $0x1d8] sm:$0xff]  ;;  %v735_v62 = vpack.c.bf16 %v99_v54, %v98_v53  ;;  %v737_v0 = vpack.c.bf16 %v117_v59, %v116_v58 }
  0x59   :  { %762 = vmatprep.subr.bf16.mxu1 %v761_v43  ;;  %v767_v63 = vpack.c.bf16 %v131_v57, %v130_v55  ;;  %v100_v1 = vld [vmem:[#allocation5 + $0x50] sm:$0xff]  ;;  %v101_v2 = vld [vmem:[#allocation5 + $0x58] sm:$0xff]  ;;  %v769_v4 = vpack.c.bf16 %v149_v61, %v148_v60  ;;  %v118_v6 = vld [vmem:[#allocation5 + $0xe0] sm:$0xff] }
  0x5a   :  { %732 = vmatpush3.bf16.msra.mxu0 %v731_v48  ;;  %v132_v3 = vld [vmem:[#allocation5 + $0x150] sm:$0xff]  ;;  %v133_v5 = vld [vmem:[#allocation5 + $0x158] sm:$0xff]  ;;  %v119_v7 = vld [vmem:[#allocation5 + $0xe8] sm:$0xff]  ;;  %v739_v10 = vpack.c.bf16 %v101_v2, %v100_v1 }
  0x5b   :  { %734 = vmatprep.subr.bf16.mxu0 %v733_v52  ;;  %v150_v8 = vld [vmem:[#allocation5 + $0x1e0] sm:$0xff]  ;;  %v151_v9 = vld [vmem:[#allocation5 + $0x1e8] sm:$0xff]  ;;  %v771_v13 = vpack.c.bf16 %v133_v5, %v132_v3  ;;  %v741_v14 = vpack.c.bf16 %v119_v7, %v118_v6  ;;  %v120_v19 = vld [vmem:[#allocation5 + $0xf0] sm:$0xff] }
  0x5c   :  { %764 = vmatpush3.bf16.msra.mxu1 %v763_v51  ;;  %v102_v11 = vld [vmem:[#allocation5 + $0x60] sm:$0xff]  ;;  %v103_v12 = vld [vmem:[#allocation5 + $0x68] sm:$0xff]  ;;  %v773_v18 = vpack.c.bf16 %v151_v9, %v150_v8  ;;  %v121_v20 = vld [vmem:[#allocation5 + $0xf8] sm:$0xff] }
  0x5d   :  { %766 = vmatprep.subr.bf16.mxu1 %v765_v56  ;;  %v134_v15 = vld [vmem:[#allocation5 + $0x160] sm:$0xff]  ;;  %v135_v16 = vld [vmem:[#allocation5 + $0x168] sm:$0xff]  ;;  %v85_v21 = vld [vmem:[#allocation2 + $0x18] sm:$0xff]  ;;  %v743_v24 = vpack.c.bf16 %v103_v12, %v102_v11  ;;  %v745_v26 = vpack.c.bf16 %v121_v20, %v120_v19 }
  0x5e   :  { %736 = vmatpush3.bf16.msra.mxu0 %v735_v62  ;;  %v83_v17 = vld [vmem:[#allocation2 + $0x8] sm:$0xff]  ;;  %v152_v22 = vld [vmem:[#allocation5 + $0x1f0] sm:$0xff]  ;;  %v153_v23 = vld [vmem:[#allocation5 + $0x1f8] sm:$0xff]  ;;  %300 = vmatprep.mubr.f32.mxu1 %v85_v21  ;;  %v775_v25 = vpack.c.bf16 %v135_v16, %v134_v15 }
  0x5f   :  { %738 = vmatprep.subr.bf16.mxu0 %v737_v0  ;;  %225 = vmatprep.mubr.f32.mxu0 %v83_v17  ;;  %v104_v27 = vld [vmem:[#allocation5 + $0x70] sm:$0xff]  ;;  %v105_v28 = vld [vmem:[#allocation5 + $0x78] sm:$0xff]  ;;  %v777_v30 = vpack.c.bf16 %v153_v23, %v152_v22  ;;  %v313_v32 = vld [vmem:[#allocation7] sm:$0xff] }
  0x60   :  { %768 = vmatpush3.bf16.msra.mxu1 %v767_v63  ;;  %v136_v29 = vld [vmem:[#allocation5 + $0x170] sm:$0xff]  ;;  %v137_v31 = vld [vmem:[#allocation5 + $0x178] sm:$0xff]  ;;  %v314_v33 = vld [vmem:[#allocation7 + $0x8] sm:$0xff]  ;;  %v747_v34 = vpack.c.bf16 %v105_v28, %v104_v27 }
  0x61   :  { %770 = vmatprep.subr.bf16.mxu1 %v769_v4  ;;  %v779_v35 = vpack.c.bf16 %v137_v31, %v136_v29  ;;  %v781_v36 = vpack.c.bf16 %v314_v33, %v313_v32  ;;  %v315_v37 = vld [vmem:[#allocation7 + $0x10] sm:$0xff]  ;;  %v316_v38 = vld [vmem:[#allocation7 + $0x18] sm:$0xff]  ;;  %v82_v39 = vld [vmem:[#allocation2] sm:$0xff] }
  0x62   :  { %740 = vmatpush3.bf16.msra.mxu0 %v739_v10  ;;  %v84_v40 = vld [vmem:[#allocation2 + $0x10] sm:$0xff]  ;;  %v87_v41 = vld [vmem:[#allocation2 + $0x28] sm:$0xff]  ;;  %v89_v42 = vld [vmem:[#allocation2 + $0x38] sm:$0xff]  ;;  %v785_v43 = vpack.c.bf16 %v316_v38, %v315_v37 }
  0x63   :  { %742 = vmatprep.subr.bf16.mxu0 %v741_v14  ;;  %v317_v44 = vld [vmem:[#allocation7 + $0x20] sm:$0xff]  ;;  %v318_v45 = vld [vmem:[#allocation7 + $0x28] sm:$0xff]  ;;  %v88_v47 = vld [vmem:[#allocation2 + $0x30] sm:$0xff] }
  0x64   :  { %772 = vmatpush3.bf16.msra.mxu1 %v771_v13  ;;  %v86_v46 = vld [vmem:[#allocation2 + $0x20] sm:$0xff]  ;;  %v789_v48 = vpack.c.bf16 %v318_v45, %v317_v44  ;;  %v319_v49 = vld [vmem:[#allocation7 + $0x30] sm:$0xff]  ;;  %v320_v50 = vld [vmem:[#allocation7 + $0x38] sm:$0xff] }
  0x65   :  { %774 = vmatprep.subr.bf16.mxu1 %v773_v18  ;;  %v793_v51 = vpack.c.bf16 %v320_v50, %v319_v49  ;;  %v321_v52 = vld [vmem:[#allocation7 + $0x40] sm:$0xff]  ;;  %v322_v53 = vld [vmem:[#allocation7 + $0x48] sm:$0xff]  ;;  %v323_v55 = vld [vmem:[#allocation7 + $0x50] sm:$0xff] }
  0x66   :  { %744 = vmatpush3.bf16.msra.mxu0 %v743_v24  ;;  %v797_v54 = vpack.c.bf16 %v322_v53, %v321_v52  ;;  %v324_v56 = vld [vmem:[#allocation7 + $0x58] sm:$0xff]  ;;  %v325_v58 = vld [vmem:[#allocation7 + $0x60] sm:$0xff]  ;;  %v326_v59 = vld [vmem:[#allocation7 + $0x68] sm:$0xff] }
  0x67   :  { %746 = vmatprep.subr.bf16.mxu0 %v745_v26  ;;  %v801_v57 = vpack.c.bf16 %v324_v56, %v323_v55  ;;  %v805_v60 = vpack.c.bf16 %v326_v59, %v325_v58  ;;  %v327_v61 = vld [vmem:[#allocation7 + $0x70] sm:$0xff]  ;;  %v328_v62 = vld [vmem:[#allocation7 + $0x78] sm:$0xff]  ;;  %v413_v0 = vld [vmem:[#allocation8] sm:$0xff] }
  0x68   :  { %776 = vmatpush3.bf16.msra.mxu1 %v775_v25  ;;  %v809_v63 = vpack.c.bf16 %v328_v62, %v327_v61  ;;  %v414_v1 = vld [vmem:[#allocation8 + $0x8] sm:$0xff]  ;;  %v415_v2 = vld [vmem:[#allocation8 + $0x10] sm:$0xff]  ;;  %v416_v4 = vld [vmem:[#allocation8 + $0x18] sm:$0xff] }
  0x69   :  { %778 = vmatprep.subr.bf16.mxu1 %v777_v30  ;;  %v813_v3 = vpack.c.bf16 %v414_v1, %v413_v0  ;;  %v817_v5 = vpack.c.bf16 %v416_v4, %v415_v2  ;;  %v417_v6 = vld [vmem:[#allocation8 + $0x20] sm:$0xff]  ;;  %v418_v7 = vld [vmem:[#allocation8 + $0x28] sm:$0xff]  ;;  %v419_v9 = vld [vmem:[#allocation8 + $0x30] sm:$0xff] }
  0x6a   :  { %748 = vmatpush3.bf16.msra.mxu0 %v747_v34  ;;  %v821_v8 = vpack.c.bf16 %v418_v7, %v417_v6  ;;  %v420_v10 = vld [vmem:[#allocation8 + $0x38] sm:$0xff]  ;;  %v421_v12 = vld [vmem:[#allocation8 + $0x40] sm:$0xff]  ;;  %v422_v13 = vld [vmem:[#allocation8 + $0x48] sm:$0xff] }
  0x6b   :  { %782 = vmatprep.subr.bf16.mxu0 %v781_v36  ;;  %v825_v11 = vpack.c.bf16 %v420_v10, %v419_v9  ;;  %v829_v14 = vpack.c.bf16 %v422_v13, %v421_v12  ;;  %v423_v15 = vld [vmem:[#allocation8 + $0x50] sm:$0xff]  ;;  %v424_v16 = vld [vmem:[#allocation8 + $0x58] sm:$0xff]  ;;  %v425_v18 = vld [vmem:[#allocation8 + $0x60] sm:$0xff] }
  0x6c   :  { %780 = vmatpush3.bf16.msra.mxu1 %v779_v35  ;;  %v833_v17 = vpack.c.bf16 %v424_v16, %v423_v15  ;;  %v426_v19 = vld [vmem:[#allocation8 + $0x68] sm:$0xff]  ;;  %v532_v22 = vld [vmem:[%s1111_s2] ss:$0 sm:$0xff] }
  0x6d   :  { %226 = vmatmul.mubr.f32.vlgmr.msra.gmra.mrb[0].mxu0 %v82_v39  ;;  %814 = vmatprep.subr.bf16.mxu1 %v813_v3  ;;  %v837_v20 = vpack.c.bf16 %v426_v19, %v425_v18  ;;  %v534_v50 = vld [vmem:[%s1115_s6] ss:$0 sm:$0xff] }
  0x6e   :  { %230 = vmatprep.mubr.f32.mxu0 %v87_v41  ;;  %784 = vmatpush3.bf16.msra.mxu0 %v781_v36  ;;  %v428_v41 = vld [vmem:[#allocation8 + $0x78] sm:$0xff] }
  0x6f   :  { %301 = vmatmul.mubr.f32.vlgmr.msra.gmra.mrb[0].mxu1 %v84_v40  ;;  %786 = vmatprep.subr.bf16.mxu0 %v785_v43  ;;  %v427_v40 = vld [vmem:[#allocation8 + $0x70] sm:$0xff] }
  0x70   :  { %305 = vmatprep.mubr.f32.mxu1 %v89_v42  ;;  %816 = vmatpush3.bf16.msra.mxu1 %v813_v3  ;;  %v841_v42 = vpack.c.bf16 %v428_v41, %v427_v40 }
  0x71   :  { %231 = vmatmul.mubr.f32.gmra.mrb[2].mxu0 %v86_v46  ;;  %818 = vmatprep.subr.bf16.mxu1 %v817_v5 }
  0x72   :  { %788 = vmatpush3.bf16.msra.mxu0 %v785_v43  ;;  %v533_v43 = vld [vmem:[%s1113_s4] ss:$0 sm:$0xff]  ;;  %s942_s4 = scalar_lea.vmem %s519_s10, 256 }
  0x73   :  { %306 = vmatmul.mubr.f32.gmra.mrb[2].mxu1 %v88_v47  ;;  %790 = vmatprep.subr.bf16.mxu0 %v789_v48  ;;  %p943_p4 = scmp.ne.s32.totalorder %s519_s10, %s942_s4  ;;  %p948_p6 = scmp.lt.s32.totalorder %s942_s4, %s942_s4 }
  0x74   :  { %820 = vmatpush3.bf16.msra.mxu1 %v817_v5 }
  0x75   :  { %822 = vmatprep.subr.bf16.mxu1 %v821_v8  ;;  %p949_p7 = por %p948_p6, %p947_p5 }
  0x76   :  { %792 = vmatpush3.bf16.msra.mxu0 %v789_v48 }
  0x77   :  { %794 = vmatprep.subr.bf16.mxu0 %v793_v51  ;;  %p950_p8 = pnand %p949_p7, %p943_p4 }
  0x78   :  { %824 = vmatpush3.bf16.msra.mxu1 %v821_v8 }
  0x79   :  { %826 = vmatprep.subr.bf16.mxu1 %v825_v11 }
  0x7a   :  { %796 = vmatpush3.bf16.msra.mxu0 %v793_v51 }
  0x7b   :  { %798 = vmatprep.subr.bf16.mxu0 %v797_v54 }
  0x7c   :  { %828 = vmatpush3.bf16.msra.mxu1 %v825_v11 }
  0x7d   :  { %830 = vmatprep.subr.bf16.mxu1 %v829_v14 }
  0x7e   :  { %800 = vmatpush3.bf16.msra.mxu0 %v797_v54 }
  0x7f   :  { %802 = vmatprep.subr.bf16.mxu0 %v801_v57 }
  0x80   :  { %832 = vmatpush3.bf16.msra.mxu1 %v829_v14 }
  0x81   :  { %834 = vmatprep.subr.bf16.mxu1 %v833_v17 }
  0x82   :  { %804 = vmatpush3.bf16.msra.mxu0 %v801_v57 }
  0x83   :  { %806 = vmatprep.subr.bf16.mxu0 %v805_v60 }
  0x84   :  { %836 = vmatpush3.bf16.msra.mxu1 %v833_v17 }
  0x85   :  { %838 = vmatprep.subr.bf16.mxu1 %v837_v20 }
  0x86   :  { %808 = vmatpush3.bf16.msra.mxu0 %v805_v60 }
  0x87   :  { %810 = vmatprep.subr.bf16.mxu0 %v809_v63 }
  0x88   :  { %840 = vmatpush3.bf16.msra.mxu1 %v837_v20 }
  0x89   :  { %842 = vmatprep.subr.bf16.mxu1 %v841_v42 }
  0x8a   :  { %812 = vmatpush3.bf16.msra.mxu0 %v809_v63 }
  0x8c   :  { %844 = vmatpush3.bf16.msra.mxu1 %v841_v42 }
 0x140   :  { %v567_v21 = vpop.f32.mrb[0].mxu0 }
 0x141   :  { %v568_v23 = vpop.f32.mrb[1].mxu0 }
 0x142   :  { %v605_v24 = vpop.f32.mrb[0].mxu1  ;;  %v569_v25 = vadd.f32 %v568_v23, %v567_v21 }
 0x143   :  { %v606_v26 = vpop.f32.mrb[1].mxu1 }
 0x144   :  { %v607_v27 = vadd.f32 %v606_v26, %v605_v24  ;;  %v228_v28 = vadd.f32 %v569_v25, %v532_v22  ;;  %v570_v29 = vpop.f32.mrb[2].mxu0 }
 0x145   :  { %v571_v30 = vpop.f32.mrb[3].mxu0 }
 0x146   :  { %v608_v31 = vpop.f32.mrb[2].mxu1  ;;  %v303_v32 = vadd.f32 %v607_v27, %v228_v28  ;;  %v572_v33 = vadd.f32 %v571_v30, %v570_v29 }
 0x147   :  { %v609_v34 = vpop.f32.mrb[3].mxu1 }
 0x148   :  { %v610_v35 = vadd.f32 %v609_v34, %v608_v31  ;;  %v311_v36 = vmax.f32 %v303_v32, 0.0  ;;  %v233_v37 = vadd.f32 %v572_v33, %v532_v22 }
 0x14a   :  { %v308_v38 = vadd.f32 %v610_v35, %v233_v37  ;;  %679 = vmatprep.mubr.f32.mxu0 %v311_v36 }
 0x14c   :  { %v312_v39 = vmax.f32 %v308_v38, 0.0 }
 0x14e   :  { %680 = vmatmul.mubr.f32.vlgmr.msra.gmra.mrb[4].mxu0 %v312_v39 }
 0x221   :  { %v681_v44 = vpop.f32.mrb[4].mxu0 }
 0x222   :  { %v408_v45 = vadd.f32 %v681_v44, %v533_v43  ;;  %v402_v46 = vpop.f32.mrb[5].mxu0 }
 0x223   :  { %v403_v47 = vadd.f32 %v533_v43, %v402_v46 }
 0x224   :  { %v412_v49 = vmax.f32 %v408_v45, 0.0 }
 0x225   :  { %v411_v48 = vmax.f32 %v403_v47, 0.0 }
 0x227   :  { %714 = vmatprep.mubr.f32.mxu1 %v411_v48 }
 0x228   :  { %715 = vmatmul.mubr.f32.vlgmr.msra.gmra.mrb[4].mxu1 %v412_v49 }
 0x2fb   :  { %v716_v51 = vpop.f32.mrb[4].mxu1 }
 0x2fc   :  { %v508_v52 = vadd.f32 %v716_v51, %v534_v50  ;;  %v502_v53 = vpop.f32.mrb[5].mxu1 }
 0x2fd   :  { %v503_v54 = vadd.f32 %v534_v50, %v502_v53 }
 0x2fe   :  { %512 = vst [vmem:[#allocation10 + $0x8] sm:$0xff] %v508_v52 }
 0x2ff   :  { %511 = vst [vmem:[#allocation10] sm:$0xff] %v503_v54 }
 0x300   :  { %953 = shalt.err (!%p950_p8)
}
 0x301   :  { %s954_s6 = scalar_lea.hbm %s1116_s7, 256 }
 0x302   :  { %p955_p9 = scmp.ne.s32.totalorder %s1116_s7, %s954_s6  ;;  %p958_p10 = scmp.lt.u32.totalorder %s954_s6, %s1116_s7 }
 0x304   :  { %p960_p11 = pnand %p958_p10, %p955_p9 }
 0x306   :  { %963 = shalt.err (!%p960_p11)
}
 0x307   :  { %524 = dma.vmem_to_hbm [thread:$0]  %s519_s10, 256, %s1116_s7, [#allocation4], %s973_s11, %s973_s11, %s974_s12  }
 0x308   :  { %970 = dma.done.wait [#allocation4], 256  }
 0x309   :  { %971 = vsyncadd [#allocation4], 4294967040 }
 0x30a   :  { %528 = vsyncpa [#allocation3], 1 }
 0x30b   :  { %529 = vsyncpa [#allocation6], 1 }
 0x30c   :  { %530 = vsyncpa [#allocation9], 1 }
 0x30d   :  { %531 = vsyncpa [#allocation4], 1 }

</bundles_post_ra>
